<compile_context>
chip_gen: v6e
topology: v6e:2x2x1
jax: 0.10.0
libtpu: 0.0.40
codegen_flags: <defaults>
</compile_context>

<pallas_src>
import jax
import jax.numpy as jnp
from jax.experimental import pallas as pl
from jax.experimental.pallas import tpu as pltpu

# ---- deterministic "parameters" of the action module S ----------------------
DT = 0.1
OMEGA = 1.0
_K_KIN = 0.5 / DT                  # kinetic prefactor (constant-folded)
_K_POT = 0.5 * DT * OMEGA ** 2     # potential prefactor
# periodic-identity coefficients: per-element  x * (A*x - C*x_prev)  sums to S
_A_COEF = 2.0 * _K_KIN + _K_POT
_C_COEF = 2.0 * _K_KIN


def _cdiv(a, b):
    return -(-a // b)


def _round8(a):
    return _cdiv(a, 8) * 8


def _device_kind():
    try:
        return jax.devices()[0].device_kind.lower()
    except Exception:
        return ""


def _vmem_capacity_bytes():
    try:
        return int(pltpu.get_tpu_info().vmem_capacity_bytes)
    except Exception:
        return 128 << 20


def _kl_with_s_kernel(x_ref, o_ref, acc_ref):
    """Grid = (splits, steps); splits is 'parallel', steps is 'arbitrary'.

    Each step reduces one (tb, N) tile to a (1, N) partial action row (pure
    VPU + one sublane reduce) and accumulates it into a tiny VMEM scratch; the
    last step of each split does the single scalar reduction and writes that
    split's raw partial sum, broadcast over its lane-dense (8, 128) out block.
    """
    i = pl.program_id(1)

    @pl.when(i == 0)
    def _init():
        acc_ref[...] = jnp.zeros_like(acc_ref)

    x = x_ref[...].astype(jnp.float32)              # (tb, N), cast after DMA
    n = x.shape[1]
    if n % 128 == 0:
        x_prev = pltpu.roll(x, shift=1, axis=1)     # periodic neighbour (XLU)
    else:
        # TODO(synk): lane-padded pltpu.roll wrap is unverified when N_nod is
        # not a multiple of 128; use an explicit (slower) concat wrap instead.
        x_prev = jnp.concatenate([x[:, n - 1:], x[:, :n - 1]], axis=1)

    # sum_n K_kin*(x_n-x_{n-1})^2 + K_pot*x_n^2 == sum_n x_n*(A*x_n - C*x_{n-1})
    contrib = x * (_A_COEF * x - _C_COEF * x_prev)
    acc_ref[...] += jnp.sum(contrib, axis=0, keepdims=True)     # (1, N)

    @pl.when(i == pl.num_programs(1) - 1)
    def _finalize():
        partial = jnp.sum(acc_ref[...], keepdims=True)           # (1, 1)
        o_ref[...] = jnp.broadcast_to(partial, o_ref.shape).astype(jnp.float32)


def _choose_tiling(B, N, itemsize, batch_tile, splits, n_buffers,
                   vmem_budget_bytes):
    # per row: n_buffers pipelined input copies + f32 elementwise-temp headroom
    per_row = N * (n_buffers * itemsize + 4)
    max_rows = max(8, (int(vmem_budget_bytes) // max(per_row, 1)) // 8 * 8)
    tb = max(8, min(int(batch_tile) - int(batch_tile) % 8, max_rows))
    b8 = _round8(B)
    tb = min(tb, b8)                         # don't over-pad tiny batches
    total_tiles = _cdiv(b8, tb)
    splits = max(1, min(int(splits), total_tiles))
    steps = _cdiv(total_tiles, splits)
    # re-derive tb so the padded extent splits*steps*tb hugs B: no whole extra
    # all-zero tiles of HBM traffic when total_tiles isn't a multiple of splits
    tb = _round8(_cdiv(b8, splits * steps))
    b_pad = splits * steps * tb
    return tb, splits, steps, b_pad


def _make_in_spec(tb, N, steps, n_buffers):
    index_map = lambda c, i: (c * steps + i, 0)
    if n_buffers != 2 and hasattr(pl, "Buffered"):
        try:
            return pl.BlockSpec((tb, N), index_map,
                                pipeline_mode=pl.Buffered(n_buffers))
        except TypeError:
            pass
    return pl.BlockSpec((tb, N), index_map)


def kl_with_s(x, log_abs_det, *, batch_tile=4096, n_core_splits=None,
              n_input_buffers=None, vmem_budget_bytes=None):
    """x: (B, N_nod), log_abs_det: (B,) -> scalar f32 loss."""
    B, N = x.shape
    kind = _device_kind()
    is_v7x = "v7" in kind
    if n_core_splits is None:
        # 2 TensorCores only on v7x; on 1-TC parts a split only adds padding.
        n_core_splits = 2 if is_v7x else 1
    if n_input_buffers is None:
        # triple-buffer on v7x (short per-step DMA), double-buffer elsewhere
        n_input_buffers = 3 if is_v7x else 2
    if vmem_budget_bytes is None:
        cap = _vmem_capacity_bytes()            # 64 MiB v7x, 128 MiB v5e/v6e
        vmem_budget_bytes = min(max(cap // 2, 16 << 20), 64 << 20)

    itemsize = jnp.dtype(x.dtype).itemsize
    tb, splits, steps, b_pad = _choose_tiling(
        B, N, itemsize, batch_tile, n_core_splits, n_input_buffers,
        vmem_budget_bytes)

    if b_pad != B:
        # zero rows contribute exactly zero action -> padding is exact
        x = jnp.concatenate([x, jnp.zeros((b_pad - B, N), x.dtype)], axis=0)

    # derive the scoped-VMEM limit from actual usage instead of hardcoding
    vmem_bytes = (n_input_buffers * tb * N * itemsize   # pipelined input bufs
                  + tb * N * 4                          # f32 temp headroom
                  + 8 * _cdiv(N, 128) * 128 * 4         # (1, N) accumulator
                  + 2 * 8 * 128 * 4)                    # out block buffers
    vmem_limit = int(min(max(vmem_bytes + (4 << 20), 16 << 20), 100 << 20))

    partials = pl.pallas_call(
        _kl_with_s_kernel,
        out_shape=jax.ShapeDtypeStruct((splits * 8, 128), jnp.float32),
        grid_spec=pltpu.PrefetchScalarGridSpec(
            num_scalar_prefetch=0,
            grid=(splits, steps),
            in_specs=[_make_in_spec(tb, N, steps, n_input_buffers)],
            out_specs=pl.BlockSpec((8, 128), lambda c, i: (c, 0)),
            scratch_shapes=[pltpu.VMEM((1, N), jnp.float32)],
        ),
        compiler_params=pltpu.CompilerParams(
            dimension_semantics=("parallel", "arbitrary"),
            vmem_limit_bytes=vmem_limit,
        ),
    )(x)

    # one representative element per split block holds that split's raw sum
    s_sum = jnp.sum(partials.reshape(splits, 8, 128)[:, 0, 0])
    loss = s_sum / jnp.float32(B) - jnp.mean(log_abs_det.astype(jnp.float32))
    loss -= (N / 2.0) * (1.0 + jnp.log(2.0 * jnp.float32(jnp.pi)))
    return loss


def _reference(x, log_abs_det):
    """Pure-JAX reference of the same forward pass (direct action form)."""
    xf = x.astype(jnp.float32)
    x_prev = jnp.roll(xf, 1, axis=1)
    s = jnp.sum(_K_KIN * (xf - x_prev) ** 2 + _K_POT * xf ** 2, axis=1)
    n_nod = x.shape[1]
    loss = jnp.mean(s - log_abs_det.astype(jnp.float32))
    loss -= n_nod / 2.0 * (1.0 + jnp.log(2.0 * jnp.float32(jnp.pi)))
    return loss


if __name__ == "__main__":
    key = jax.random.PRNGKey(0)
    kx, kl_ = jax.random.split(key)

    # small shapes consistent with the module: batch of lattice configurations
    B, N_NOD = 16, 128
    x = jax.random.normal(kx, (B, N_NOD), dtype=jnp.float32)
    log_abs_det = jax.random.normal(kl_, (B,), dtype=jnp.float32)

    loss = jax.block_until_ready(kl_with_s(x, log_abs_det))
    ref = jax.block_until_ready(_reference(x, log_abs_det))
    assert jnp.allclose(loss, ref, rtol=1e-3, atol=1e-3), (loss, ref)

    # exercise the multi-step / ragged-batch tb-granular padding path
    kx2, kl2 = jax.random.split(jax.random.PRNGKey(1))
    B2 = 52
    x2 = jax.random.normal(kx2, (B2, N_NOD), dtype=jnp.float32)
    lad2 = jax.random.normal(kl2, (B2,), dtype=jnp.float32)
    loss2 = jax.block_until_ready(kl_with_s(x2, lad2, batch_tile=8))
    ref2 = jax.block_until_ready(_reference(x2, lad2))
    assert jnp.allclose(loss2, ref2, rtol=1e-3, atol=1e-3), (loss2, ref2)

    # bf16 input path (halves HBM traffic; f32 cast happens post-DMA in-kernel)
    x3 = x.astype(jnp.bfloat16)
    loss3 = jax.block_until_ready(kl_with_s(x3, log_abs_det))
    ref3 = jax.block_until_ready(_reference(x3, log_abs_det))
    assert jnp.allclose(loss3, ref3, rtol=1e-3, atol=1e-3), (loss3, ref3)

    print("KERNEL_OK")
</pallas_src>

<mosaic_0001>
module attributes {stable_mosaic.version = 11 : i64} {
  func.func @_kl_with_s_kernel(%arg0: i32, %arg1: i32, %arg2: memref<16x128xf32, #tpu.memory_space<vmem>>, %arg3: memref<8x128xf32, #tpu.memory_space<vmem>>, %arg4: memref<1x128xf32, #tpu.memory_space<vmem>>) attributes {dimension_semantics = [#tpu.dimension_semantics<parallel>, #tpu.dimension_semantics<arbitrary>], iteration_bounds = array<i64: 1, 1>, scalar_prefetch = 0 : i64, scratch_operands = 1 : i64, tpu.core_type = #tpu.core_type<tc>, window_params = [{transform_indices = @transform_0, window_bounds = array<i64: 16, 128>}, {transform_indices = @transform_1, window_bounds = array<i64: 8, 128>}]} {
    %c0_i32 = arith.constant 0 : i32
    %0 = arith.cmpi eq, %arg1, %c0_i32 : i32
    %1 = arith.extui %0 : i1 to i32
    %c0_i32_0 = arith.constant 0 : i32
    %2 = arith.cmpi ne, %1, %c0_i32_0 : i32
    scf.if %2 {
      %cst_10 = arith.constant 0.000000e+00 : f32
      %19 = vector.broadcast %cst_10 : f32 to vector<1x128xf32>
      %c0_11 = arith.constant 0 : index
      %c0_12 = arith.constant 0 : index
      %20 = vector.load %arg4[%c0_11, %c0_12] : memref<1x128xf32, #tpu.memory_space<vmem>>, vector<1x128xf32>
      tpu.vector_store %arg4[%c0_11, %c0_12], %19 {strides = array<i32>} : memref<1x128xf32, #tpu.memory_space<vmem>>, vector<1x128xf32>,
    } else {
    }
    %c0 = arith.constant 0 : index
    %c0_1 = arith.constant 0 : index
    %3 = vector.load %arg2[%c0, %c0_1] : memref<16x128xf32, #tpu.memory_space<vmem>>, vector<16x128xf32>
    %c1_i32 = arith.constant 1 : i32
    %4 = tpu.dynamic_rotate %3 by %c1_i32 dim 1 : vector<16x128xf32>, i32 -> vector<16x128xf32>
    %cst = arith.constant 1.005000e+01 : f32
    %5 = vector.broadcast %cst : f32 to vector<16x128xf32>
    %6 = arith.mulf %5, %3 : vector<16x128xf32>
    %cst_2 = arith.constant 1.000000e+01 : f32
    %7 = vector.broadcast %cst_2 : f32 to vector<16x128xf32>
    %8 = arith.mulf %7, %4 : vector<16x128xf32>
    %9 = arith.subf %6, %8 : vector<16x128xf32>
    %10 = arith.mulf %3, %9 : vector<16x128xf32>
    %c0_3 = arith.constant 0 : index
    %c0_4 = arith.constant 0 : index
    %11 = vector.load %arg4[%c0_3, %c0_4] : memref<1x128xf32, #tpu.memory_space<vmem>>, vector<1x128xf32>
    %cst_5 = arith.constant dense<0.000000e+00> : vector<128xf32>
    %12 = vector.multi_reduction <add>, %10, %cst_5 [0] : vector<16x128xf32> to vector<128xf32>
    %13 = vector.shape_cast %12 : vector<128xf32> to vector<1x128xf32>
    %14 = arith.addf %11, %13 : vector<1x128xf32>
    %c0_6 = arith.constant 0 : index
    %c0_7 = arith.constant 0 : index
    %15 = vector.load %arg4[%c0_6, %c0_7] : memref<1x128xf32, #tpu.memory_space<vmem>>, vector<1x128xf32>
    tpu.vector_store %arg4[%c0_6, %c0_7], %14 {strides = array<i32>} : memref<1x128xf32, #tpu.memory_space<vmem>>, vector<1x128xf32>,
    %c0_i32_8 = arith.constant 0 : i32
    %16 = arith.cmpi eq, %arg1, %c0_i32_8 : i32
    %17 = arith.extui %16 : i1 to i32
    %c0_i32_9 = arith.constant 0 : i32
    %18 = arith.cmpi ne, %17, %c0_i32_9 : i32
    scf.if %18 {
      %c0_10 = arith.constant 0 : index
      %c0_11 = arith.constant 0 : index
      %19 = vector.load %arg4[%c0_10, %c0_11] : memref<1x128xf32, #tpu.memory_space<vmem>>, vector<1x128xf32>
      %20 = vector.shape_cast %19 : vector<1x128xf32> to vector<1x1x128xf32>
      %cst_12 = arith.constant dense<0.000000e+00> : vector<1xf32>
      %21 = vector.multi_reduction <add>, %20, %cst_12 [1, 2] : vector<1x1x128xf32> to vector<1xf32>
      %22 = vector.shape_cast %21 : vector<1xf32> to vector<1x1x1xf32>
      %23 = vector.extract %22[0, 0, 0] : f32 from vector<1x1x1xf32>
      %24 = vector.broadcast %23 : f32 to vector<1x1xf32>
      %25 = vector.shape_cast %24 : vector<1x1xf32> to vector<1x1xf32>
      %26 = vector.broadcast %25 : vector<1x1xf32> to vector<8x128xf32>
      %c0_13 = arith.constant 0 : index
      %c0_14 = arith.constant 0 : index
      %27 = vector.load %arg3[%c0_13, %c0_14] : memref<8x128xf32, #tpu.memory_space<vmem>>, vector<8x128xf32>
      tpu.vector_store %arg3[%c0_13, %c0_14], %26 {strides = array<i32>} : memref<8x128xf32, #tpu.memory_space<vmem>>, vector<8x128xf32>,
    } else {
    }
    return
  }
  func.func @transform_0(%arg0: i32, %arg1: i32) -> (i32, i32) {
    %c1_i32 = arith.constant 1 : i32
    %0 = arith.muli %arg0, %c1_i32 : i32
    %1 = arith.addi %0, %arg1 : i32
    %c0_i32 = arith.constant 0 : i32
    %c0_i32_0 = arith.constant 0 : i32
    return %1, %c0_i32 : i32, i32
  }
  func.func @transform_1(%arg0: i32, %arg1: i32) -> (i32, i32) {
    %c0_i32 = arith.constant 0 : i32
    %c0_i32_0 = arith.constant 0 : i32
    return %arg0, %c0_i32 : i32, i32
  }
}

</mosaic_0001>

<bundles_post_ra>
// kernel: tpu_custom_call.1
= control target key start
LH: loop header
LB: loop body
LE: loop exit
PB: predicated region body
PF: predicated region fallthrough
CT: control target
= control target key end

     0   :  { %6 = vsyncpa [#allocation4], 0  ;;  %s164_s0 = inlined_call_operand.hbm [shape: f32[16,128], index: 0, kind: input, shape index: {}]   ;;  %s165_s1 = inlined_call_operand.hbm [shape: f32[8,128], index: 1, kind: output, shape index: {}]  }
   0x1   :  { %7 = vsyncpa [#allocation5], 0  ;;  %s142_s6 = smov [#allocation3]  }
   0x2   :  { %s17_s7 = sshll.u32 %s142_s6, 4  ;;  %s18_s7 = int_to_ptr.vmem [resolvable:$true] %s17_s7 }
   0x3   :  { %s106_s8 = scalar_lea.vmem %s18_s7, 256  ;;  %p111_p1 = scmp.lt.s32.totalorder %s18_s7, %s18_s7 }
   0x4   :  { %p107_p0 = scmp.ne.s32.totalorder %s18_s7, %s106_s8  ;;  %p112_p2 = scmp.lt.s32.totalorder %s106_s8, %s106_s8 }
   0x6   :  { %p113_p3 = por %p112_p2, %p111_p1 }
   0x8   :  { %p114_p4 = pnand %p113_p3, %p107_p0 }
   0xa   :  { %117 = shalt.err (!%p114_p4)
}
   0xb   :  { %s143_s9 = smov 128   ;;  %s144_s10 = smov 8  }
   0xc   :  { %23 = dma.hbm_to_vmem [thread:$0]  %s164_s0, 256, %s18_s7, [#allocation4], %s143_s9, %s143_s9, %s144_s10  }
   0xd   :  { %138 = dma.done.wait [#allocation4], 256  }
   0xe   :  { %139 = vsyncadd [#allocation4], 4294967040  ;;  %v145_v0 = vmov 0.0   ;;  %v34_v1 = vld [vmem:[#allocation3] sm:$0xff]  ;;  %s146_s13 = smov 1   ;;  %v35_v2 = vld [vmem:[#allocation3 + $0x8] sm:$0xff] }
   0xf   :  { %33 = vst [vmem:[#allocation2] sm:$0x1] %v145_v0  ;;  %36 = vrot.lane.b32.xlu0 %v34_v1, %s146_s13  ;;  %v40_v4 = vmul.f32 10.05, %v34_v1  ;;  %v41_v6 = vmul.f32 10.05, %v35_v2 }
  0x10   :  { %vm62_vm0 = vcmask 1040384   ;;  %s147_s0 = smov [#allocation6]  }
  0x11   :  { %s81_s14 = sshll.u32 %s147_s0, 4  ;;  %s82_s14 = int_to_ptr.vmem [resolvable:$true] %s81_s14 }
  0x12   :  { %s118_s16 = scalar_lea.vmem %s82_s14, 128  ;;  %p123_p6 = scmp.lt.s32.totalorder %s82_s14, %s82_s14 }
  0x13   :  { %38 = vrot.lane.b32.xlu0 %v35_v2, %s146_s13  ;;  %p119_p5 = scmp.ne.s32.totalorder %s82_s14, %s118_s16  ;;  %p124_p7 = scmp.lt.s32.totalorder %s118_s16, %s118_s16 }
  0x15   :  { %p125_p8 = por %p124_p7, %p123_p6 }
  0x16   :  { %v48_v19 = vld [vmem:[#allocation2] sm:$0x1] }
  0x17   :  { %p126_p9 = pnand %p125_p8, %p119_p5 }
  0x81   :  { %v37_v3 = vpop.permute.xlu0 %36 }
  0x82   :  { %v42_v5 = vmul.f32 10.0, %v37_v3 }
  0x84   :  { %v44_v8 = vsub.f32 %v40_v4, %v42_v5 }
  0x85   :  { %v39_v7 = vpop.permute.xlu0 %38 }
  0x86   :  { %v43_v9 = vmul.f32 10.0, %v39_v7  ;;  %v46_v11 = vmul.f32 %v44_v8, %v34_v1 }
  0x88   :  { %v45_v10 = vsub.f32 %v41_v6, %v43_v9 }
  0x8a   :  { %v47_v12 = vmul.f32 %v45_v10, %v35_v2 }
  0x8c   :  { %v49_v13 = vadd.f32 %v47_v12, %v46_v11 }
  0x8e   :  { %v50_v14 = vrot.slane %v49_v13, 4 }
  0x90   :  { %v51_v15 = vadd.f32 %v50_v14, %v49_v13 }
  0x92   :  { %v52_v16 = vrot.slane %v51_v15, 2 }
  0x94   :  { %v53_v17 = vadd.f32 %v52_v16, %v51_v15 }
  0x96   :  { %v54_v18 = vrot.slane %v53_v17, 1 }
  0x98   :  { %v55_v20 = vadd.f32 %v54_v18, %v53_v17 }
  0x9a   :  { %v56_v21 = vadd.f32 %v55_v20, %v48_v19 }
  0x9c   :  { %57 = vst [vmem:[#allocation2] sm:$0x1] %v56_v21 }
  0xa3   :  { %v61_v22 = vld [vmem:[#allocation2] sm:$0x1] }
  0xa4   :  { %v63_v23 = vsel %vm62_vm0, %v61_v22, 0.0 }
  0xa5   :  { %64 = vadd.xlane.f32.xlu1 %v63_v23 }
 0x12e   :  { %v65_v24 = vpop.xlane.xlu1 %64 }
 0x12f   :  { %v66_v25 = vrot.slane %v65_v24, 4 }
 0x131   :  { %v67_v26 = vadd.f32 %v66_v25, %v65_v24 }
 0x133   :  { %v68_v27 = vrot.slane %v67_v26, 2 }
 0x135   :  { %v69_v28 = vadd.f32 %v68_v27, %v67_v26 }
 0x137   :  { %v70_v29 = vrot.slane %v69_v28, 1 }
 0x139   :  { %v71_v30 = vadd.f32 %v70_v29, %v69_v28 }
 0x13b   :  { %90 = vpush %v71_v30 }
 0x16c   :  { %s91_s15 = spop %90 }
 0x16d   :  { %v73_v31 = vstv %s91_s15 }
 0x16e   :  { %74 = vst [vmem:[#allocation6] sm:$0xff] %v73_v31 }
 0x16f   :  { %129 = shalt.err (!%p126_p9)
}
 0x170   :  { %84 = dma.vmem_to_hbm [thread:$0]  %s82_s14, 128, %s165_s1, [#allocation5]  }
 0x171   :  { %140 = dma.done.wait [#allocation5], 128  }
 0x172   :  { %141 = vsyncadd [#allocation5], 4294967168 }
 0x173   :  { %88 = vsyncpa [#allocation4], 1 }
 0x174   :  { %89 = vsyncpa [#allocation5], 1 }

</bundles_post_ra>
